<compile_context>
chip_gen: v7x
topology: tpu7x:2x2x1
jax: 0.10.0
libtpu: 0.0.40
codegen_flags: <defaults>
</compile_context>

<pallas_src>
import functools

import jax
import jax.numpy as jnp
from jax.experimental import pallas as pl
from jax.experimental.pallas import tpu as pltpu


_EPS = 1e-8  # matches torch.nn.functional.cosine_similarity default eps


def _round_up(x, m):
    return ((x + m - 1) // m) * m


def _default_vmem_limit_bytes():
    # v7x TensorCores have 64 MiB VMEM (cap ~48 MiB); v5e/v6e have 128 MiB.
    try:
        kind = jax.devices()[0].device_kind.lower()
    except Exception:
        kind = ""
    if ("v5" in kind) or ("v6" in kind):
        return 96 * 1024 * 1024
    return 48 * 1024 * 1024


# ----------------------------------------------------------------------------
# Persistent queue preparation (one-time layout plumbing, NOT per forward).
# ----------------------------------------------------------------------------
def prepare_queue(queue):
    """L2-normalize rows, transpose to (P, Q_pad), bf16, Q_pad multiple of 128.

    In a training loop this array should be maintained in this layout by the
    queue-update step rather than rebuilt every forward call.
    """
    Q, _ = queue.shape
    qf = queue.astype(jnp.float32)
    inv = jax.lax.rsqrt(
        jnp.maximum(jnp.sum(qf * qf, axis=-1, keepdims=True), _EPS * _EPS))
    qn = (qf * inv).astype(jnp.bfloat16)            # normalize BEFORE padding
    q_pad = _round_up(Q, 128)
    queue_t = jnp.pad(qn.T, ((0, 0), (0, q_pad - Q)))   # (P, Q_pad)
    return queue_t, Q


# ----------------------------------------------------------------------------
# Fused kernel: both projection heads + positive & negative cosine logits.
# Grid: (batch tile i [parallel], queue tile j [arbitrary]).
# ----------------------------------------------------------------------------
def _moco_fused_kernel(x_ref, xm_ref,
                       w1_ref, b1_ref, w2_ref, b2_ref,
                       w1m_ref, b1m_ref, w2m_ref, b2m_ref,
                       queue_t_ref,
                       pos_ref, neg_ref,
                       qhat_ref,
                       *, inv_temp):
    j = pl.program_id(1)

    # Projections + positive logit: computed once per batch tile (j == 0);
    # the (temperature-scaled, bf16) normalized query persists in VMEM scratch
    # across the queue sweep.
    @pl.when(j == 0)
    def _():
        # bf16 MXU operands, f32 accumulation; biases / gelu / norm in f32.
        x = x_ref[...]
        xm = xm_ref[...]

        # trainable head
        h = jnp.dot(x, w1_ref[...], preferred_element_type=jnp.float32) + b1_ref[...]
        h = jax.nn.gelu(h)   # NOTE: tanh approx; torch F.gelu is exact erf
        q = jnp.dot(h.astype(jnp.bfloat16), w2_ref[...],
                    preferred_element_type=jnp.float32) + b2_ref[...]

        # momentum head
        hm = jnp.dot(xm, w1m_ref[...], preferred_element_type=jnp.float32) + b1m_ref[...]
        hm = jax.nn.gelu(hm)
        k = jnp.dot(hm.astype(jnp.bfloat16), w2m_ref[...],
                    preferred_element_type=jnp.float32) + b2m_ref[...]

        # Inverse L2 norms on the EUP; clamping the squared norm at eps^2 is
        # equivalent to torch's max(||v||, eps) denominator.
        q_inv = jax.lax.rsqrt(jnp.maximum(jnp.sum(q * q, axis=-1, keepdims=True),
                                          _EPS * _EPS))
        k_inv = jax.lax.rsqrt(jnp.maximum(jnp.sum(k * k, axis=-1, keepdims=True),
                                          _EPS * _EPS))
        q_hat = q * q_inv
        k_hat = k * k_inv

        pos = jnp.sum(q_hat * k_hat, axis=-1, keepdims=True) * inv_temp   # (bm, 1)
        pos_ref[...] = jnp.broadcast_to(pos, pos_ref.shape).astype(pos_ref.dtype)

        # Fold 1/temperature into the query once (bf16 scratch); the inner
        # queue loop is then a pure dot + store.
        qhat_ref[...] = (q_hat * inv_temp).astype(qhat_ref.dtype)

    # Negative logits against this queue tile.  The queue tile is already
    # L2-normalized, bf16, and in MXU layout (P, tq): no per-tile VPU/XLU work.
    neg_ref[...] = jnp.dot(qhat_ref[...], queue_t_ref[...],
                           preferred_element_type=jnp.float32).astype(neg_ref.dtype)


def moco_fused_forward(params, x, x_m, queue_prepared, temperature,
                       *, bm=512, tq=1024, vmem_limit_bytes=None):
    queue_t, Q = queue_prepared
    B, E = x.shape
    P, q_pad = queue_t.shape

    # Batch tile: multiple of 8 sublanes; cap at ceil(B/2) (rounded up to 8)
    # so the 'parallel' batch axis has >= 2 programs for the v7x megacore.
    bm = max(8, min(bm, _round_up(pl.cdiv(B, 2), 8)))
    nb = pl.cdiv(B, bm)
    B_pad = nb * bm

    tq = min(tq, q_pad)                 # q_pad is a multiple of 128, so tq is too
    nq = pl.cdiv(q_pad, tq)

    if vmem_limit_bytes is None:
        vmem_limit_bytes = _default_vmem_limit_bytes()

    # bf16 operand copies (weights / activations); biases stay f32.
    # NOTE(perf): in training, keep these bf16 copies persistent alongside the
    # f32 master weights so the cast is not redone each step.
    xb = x.astype(jnp.bfloat16)
    xmb = x_m.astype(jnp.bfloat16)
    if B_pad != B:
        pad = ((0, B_pad - B), (0, 0))
        xb = jnp.pad(xb, pad)           # zero rows -> finite scratch values
        xmb = jnp.pad(xmb, pad)
    w1b = params["w1"].astype(jnp.bfloat16)
    w2b = params["w2"].astype(jnp.bfloat16)
    w1mb = params["w1_m"].astype(jnp.bfloat16)
    w2mb = params["w2_m"].astype(jnp.bfloat16)

    full = lambda shape: pl.BlockSpec(shape, lambda i, j: (0, 0))

    pos_pad, neg_pad = pl.pallas_call(
        functools.partial(_moco_fused_kernel, inv_temp=float(1.0 / temperature)),
        out_shape=(jax.ShapeDtypeStruct((B_pad, 128), jnp.float32),
                   jax.ShapeDtypeStruct((B_pad, q_pad), jnp.float32)),
        grid=(nb, nq),
        in_specs=[
            pl.BlockSpec((bm, E), lambda i, j: (i, 0)),     # x (bf16)
            pl.BlockSpec((bm, E), lambda i, j: (i, 0)),     # x_m (bf16)
            full((E, E)), full((1, E)), full((E, P)), full((1, P)),   # head
            full((E, E)), full((1, E)), full((E, P)), full((1, P)),   # momentum head
            pl.BlockSpec((P, tq), lambda i, j: (0, j)),     # queue (bf16, pre-normalized)
        ],
        out_specs=(
            pl.BlockSpec((bm, 128), lambda i, j: (i, 0)),   # pos (lane-dense slab)
            pl.BlockSpec((bm, tq), lambda i, j: (i, j)),    # neg (lane-dense tiles)
        ),
        scratch_shapes=[pltpu.VMEM((bm, P), jnp.bfloat16)], # qhat * 1/T, persists over j
        compiler_params=pltpu.CompilerParams(
            dimension_semantics=("parallel", "arbitrary"),
            vmem_limit_bytes=vmem_limit_bytes),
    )(xb, xmb,
      w1b, params["b1"], w2b, params["b2"],
      w1mb, params["b1_m"], w2mb, params["b2_m"],
      queue_t)

    return jnp.concatenate([pos_pad[:B, :1], neg_pad[:B, :Q]], axis=1)


# ----------------------------------------------------------------------------
# Projection-only path (only_proj=True): 2-layer head, batch-tiled grid.
# ----------------------------------------------------------------------------
def _proj_kernel(x_ref, w1_ref, b1_ref, w2_ref, b2_ref, out_ref):
    h = jnp.dot(x_ref[...], w1_ref[...], preferred_element_type=jnp.float32) + b1_ref[...]
    h = jax.nn.gelu(h)
    y = jnp.dot(h.astype(jnp.bfloat16), w2_ref[...],
                preferred_element_type=jnp.float32) + b2_ref[...]
    out_ref[...] = y.astype(out_ref.dtype)


def projection_head(x, w1, b1, w2, b2, *, bm=512, vmem_limit_bytes=None):
    B, E = x.shape
    P = w2.shape[1]
    bm = max(8, min(bm, _round_up(pl.cdiv(B, 2), 8)))
    nb = pl.cdiv(B, bm)
    B_pad = nb * bm
    if vmem_limit_bytes is None:
        vmem_limit_bytes = _default_vmem_limit_bytes()

    xb = x.astype(jnp.bfloat16)
    if B_pad != B:
        xb = jnp.pad(xb, ((0, B_pad - B), (0, 0)))

    full = lambda shape: pl.BlockSpec(shape, lambda i: (0, 0))
    out = pl.pallas_call(
        _proj_kernel,
        out_shape=jax.ShapeDtypeStruct((B_pad, P), jnp.float32),
        grid=(nb,),
        in_specs=[pl.BlockSpec((bm, E), lambda i: (i, 0)),
                  full((E, E)), full((1, E)), full((E, P)), full((1, P))],
        out_specs=pl.BlockSpec((bm, P), lambda i: (i, 0)),
        compiler_params=pltpu.CompilerParams(
            dimension_semantics=("parallel",),
            vmem_limit_bytes=vmem_limit_bytes),
    )(xb, w1.astype(jnp.bfloat16), b1, w2.astype(jnp.bfloat16), b2)
    return out[:B]


# ----------------------------------------------------------------------------
# MoCoHead forward (functional)
# ----------------------------------------------------------------------------
def moco_head_forward(params, x, x_m, queue, temperature, only_proj=False,
                      queue_prepared=None):
    if only_proj:
        return projection_head(x, params["w1"], params["b1"],
                               params["w2"], params["b2"])
    if queue_prepared is None:
        # Fallback; in a training loop pass a persistently-maintained prepared
        # queue so this layout/normalization pass is not redone every forward.
        queue_prepared = prepare_queue(queue)
    logits = moco_fused_forward(params, x, x_m, queue_prepared, temperature)
    # NOTE: torch uses int64 labels; int32 is the natural TPU choice here.
    labels = jnp.zeros((x.shape[0],), dtype=jnp.int32)
    return logits, labels


def init_params(key, encoder_embed_dim, projection_dim):
    k1, k2, k3, k4 = jax.random.split(key, 4)
    E, P = encoder_embed_dim, projection_dim
    # nn.Linear-style uniform init, weights stored pre-transposed as (in, out)
    lim1 = 1.0 / (E ** 0.5)
    w1 = jax.random.uniform(k1, (E, E), jnp.float32, -lim1, lim1)
    b1 = jax.random.uniform(k2, (1, E), jnp.float32, -lim1, lim1)
    w2 = jax.random.uniform(k3, (E, P), jnp.float32, -lim1, lim1)
    b2 = jax.random.uniform(k4, (1, P), jnp.float32, -lim1, lim1)
    # copy_weights(): momentum head starts as an exact copy
    return {
        "w1": w1, "b1": b1, "w2": w2, "b2": b2,
        "w1_m": w1, "b1_m": b1, "w2_m": w2, "b2_m": b2,
    }


def _reference_forward(params, x, x_m, queue, temperature):
    def proj(x, w1, b1, w2, b2):
        return jax.nn.gelu(x @ w1 + b1) @ w2 + b2
    q = proj(x, params["w1"], params["b1"], params["w2"], params["b2"])
    k = proj(x_m, params["w1_m"], params["b1_m"], params["w2_m"], params["b2_m"])
    qn = jnp.maximum(jnp.linalg.norm(q, axis=-1, keepdims=True), _EPS)
    kn = jnp.maximum(jnp.linalg.norm(k, axis=-1, keepdims=True), _EPS)
    un = jnp.maximum(jnp.linalg.norm(queue, axis=-1, keepdims=True), _EPS)
    pos = jnp.sum(q * k, axis=-1, keepdims=True) / (qn * kn)
    neg = (q @ queue.T) / (qn * un.T)
    return jnp.concatenate([pos, neg], axis=1) / temperature, q


if __name__ == "__main__":
    key = jax.random.PRNGKey(0)
    kx, kxm, kq, kp = jax.random.split(key, 4)

    B = 8            # max_sentences (batch)
    E = 32           # encoder_embed_dim
    P = 16           # moco_projection_dim
    QLEN = 32        # moco_queue_length
    temperature = 0.07

    params = init_params(kp, E, P)
    x = jax.random.normal(kx, (B, E), jnp.float32)
    x_m = jax.random.normal(kxm, (B, E), jnp.float32)
    queue = jax.random.normal(kq, (QLEN, P), jnp.float32)

    # One-time, persistent kernel-ready queue layout.
    queue_prep = jax.block_until_ready(prepare_queue(queue)[0]), QLEN

    logits, labels = moco_head_forward(params, x, x_m, queue, temperature,
                                       queue_prepared=queue_prep)
    logits = jax.block_until_ready(logits)
    labels = jax.block_until_ready(labels)

    q_only = jax.block_until_ready(
        moco_head_forward(params, x, x_m, queue, temperature, only_proj=True))

    ref_logits, ref_q = _reference_forward(params, x, x_m, queue, temperature)

    assert logits.shape == (B, 1 + QLEN), logits.shape
    assert labels.shape == (B,), labels.shape
    assert q_only.shape == (B, P), q_only.shape
    # bf16 operands on the MXU path: ~1e-2 tolerance on cosine values, i.e.
    # ~1.2e-1 after the 1/temperature (=14.3) scale; f32 reference throughout.
    max_err = float(jnp.max(jnp.abs(logits - ref_logits)))
    assert jnp.allclose(logits, ref_logits, atol=1.2e-1, rtol=1e-2), max_err
    assert jnp.allclose(q_only, ref_q, atol=1e-2, rtol=1e-2), \
        float(jnp.max(jnp.abs(q_only - ref_q)))

    print("KERNEL_OK")
</pallas_src>

<mosaic_0001>
module attributes {stable_mosaic.version = 11 : i64} {
  func.func @_moco_fused_kernel(%arg0: i32, %arg1: i32, %arg2: memref<8x32xbf16, #tpu.memory_space<vmem>>, %arg3: memref<8x32xbf16, #tpu.memory_space<vmem>>, %arg4: memref<32x32xbf16, #tpu.memory_space<vmem>>, %arg5: memref<1x32xf32, #tpu.memory_space<vmem>>, %arg6: memref<32x16xbf16, #tpu.memory_space<vmem>>, %arg7: memref<1x16xf32, #tpu.memory_space<vmem>>, %arg8: memref<32x32xbf16, #tpu.memory_space<vmem>>, %arg9: memref<1x32xf32, #tpu.memory_space<vmem>>, %arg10: memref<32x16xbf16, #tpu.memory_space<vmem>>, %arg11: memref<1x16xf32, #tpu.memory_space<vmem>>, %arg12: memref<16x128xbf16, #tpu.memory_space<vmem>>, %arg13: memref<8x128xf32, #tpu.memory_space<vmem>>, %arg14: memref<8x128xf32, #tpu.memory_space<vmem>>, %arg15: memref<8x16xbf16, #tpu.memory_space<vmem>>) attributes {dimension_semantics = [#tpu.dimension_semantics<parallel>, #tpu.dimension_semantics<arbitrary>], iteration_bounds = array<i64: 1, 1>, scalar_prefetch = 0 : i64, scratch_operands = 1 : i64, tpu.core_type = #tpu.core_type<tc>, window_params = [{transform_indices = @transform_0, window_bounds = array<i64: 8, 32>}, {transform_indices = @transform_1, window_bounds = array<i64: 8, 32>}, {pipeline_mode = #tpu.pipeline_mode<synchronous>, transform_indices = @transform_2, window_bounds = array<i64: 32, 32>}, {pipeline_mode = #tpu.pipeline_mode<synchronous>, transform_indices = @transform_3, window_bounds = array<i64: 1, 32>}, {pipeline_mode = #tpu.pipeline_mode<synchronous>, transform_indices = @transform_4, window_bounds = array<i64: 32, 16>}, {pipeline_mode = #tpu.pipeline_mode<synchronous>, transform_indices = @transform_5, window_bounds = array<i64: 1, 16>}, {pipeline_mode = #tpu.pipeline_mode<synchronous>, transform_indices = @transform_6, window_bounds = array<i64: 32, 32>}, {pipeline_mode = #tpu.pipeline_mode<synchronous>, transform_indices = @transform_7, window_bounds = array<i64: 1, 32>}, {pipeline_mode = #tpu.pipeline_mode<synchronous>, transform_indices = @transform_8, window_bounds = array<i64: 32, 16>}, {pipeline_mode = #tpu.pipeline_mode<synchronous>, transform_indices = @transform_9, window_bounds = array<i64: 1, 16>}, {transform_indices = @transform_10, window_bounds = array<i64: 16, 128>}, {transform_indices = @transform_11, window_bounds = array<i64: 8, 128>}, {transform_indices = @transform_12, window_bounds = array<i64: 8, 128>}]} {
    %c0_i32 = arith.constant 0 : i32
    %0 = arith.cmpi eq, %arg1, %c0_i32 : i32
    %1 = arith.extui %0 : i1 to i32
    %c0_i32_0 = arith.constant 0 : i32
    %2 = arith.cmpi ne, %1, %c0_i32_0 : i32
    scf.if %2 {
      %c0_6 = arith.constant 0 : index
      %c0_7 = arith.constant 0 : index
      %7 = vector.load %arg2[%c0_6, %c0_7] : memref<8x32xbf16, #tpu.memory_space<vmem>>, vector<8x32xbf16>
      %c0_8 = arith.constant 0 : index
      %c0_9 = arith.constant 0 : index
      %8 = vector.load %arg3[%c0_8, %c0_9] : memref<8x32xbf16, #tpu.memory_space<vmem>>, vector<8x32xbf16>
      %c0_10 = arith.constant 0 : index
      %c0_11 = arith.constant 0 : index
      %9 = vector.load %arg4[%c0_10, %c0_11] : memref<32x32xbf16, #tpu.memory_space<vmem>>, vector<32x32xbf16>
      %cst_12 = arith.constant dense<0.000000e+00> : vector<8x32xf32>
      %10 = tpu.matmul %7, %9, %cst_12 {dimension_numbers = #tpu.dot_dimension_numbers<[1], [0], [0], [1], [0, 0, 1, 1], [], []>} : vector<8x32xbf16>, vector<32x32xbf16>, vector<8x32xf32> -> vector<8x32xf32>
      %c0_13 = arith.constant 0 : index
      %c0_14 = arith.constant 0 : index
      %11 = vector.load %arg5[%c0_13, %c0_14] : memref<1x32xf32, #tpu.memory_space<vmem>>, vector<1x32xf32>
      %12 = vector.broadcast %11 : vector<1x32xf32> to vector<8x32xf32>
      %13 = arith.addf %10, %12 : vector<8x32xf32>
      %14 = arith.mulf %13, %13 : vector<8x32xf32>
      %15 = arith.mulf %13, %14 : vector<8x32xf32>
      %cst_15 = arith.constant 4.471500e-02 : f32
      %16 = vector.broadcast %cst_15 : f32 to vector<8x32xf32>
      %17 = arith.mulf %16, %15 : vector<8x32xf32>
      %18 = arith.addf %13, %17 : vector<8x32xf32>
      %cst_16 = arith.constant 0.797884583 : f32
      %19 = vector.broadcast %cst_16 : f32 to vector<8x32xf32>
      %20 = arith.mulf %19, %18 : vector<8x32xf32>
      %21 = math.tanh %20 : vector<8x32xf32>
      %cst_17 = arith.constant 1.000000e+00 : f32
      %22 = vector.broadcast %cst_17 : f32 to vector<8x32xf32>
      %23 = arith.addf %22, %21 : vector<8x32xf32>
      %cst_18 = arith.constant 5.000000e-01 : f32
      %24 = vector.broadcast %cst_18 : f32 to vector<8x32xf32>
      %25 = arith.mulf %24, %23 : vector<8x32xf32>
      %26 = arith.mulf %13, %25 : vector<8x32xf32>
      %27 = arith.truncf %26 : vector<8x32xf32> to vector<8x32xbf16>
      %c0_19 = arith.constant 0 : index
      %c0_20 = arith.constant 0 : index
      %28 = vector.load %arg6[%c0_19, %c0_20] : memref<32x16xbf16, #tpu.memory_space<vmem>>, vector<32x16xbf16>
      %cst_21 = arith.constant dense<0.000000e+00> : vector<8x16xf32>
      %29 = tpu.matmul %27, %28, %cst_21 {dimension_numbers = #tpu.dot_dimension_numbers<[1], [0], [0], [1], [0, 0, 1, 1], [], []>} : vector<8x32xbf16>, vector<32x16xbf16>, vector<8x16xf32> -> vector<8x16xf32>
      %c0_22 = arith.constant 0 : index
      %c0_23 = arith.constant 0 : index
      %30 = vector.load %arg7[%c0_22, %c0_23] : memref<1x16xf32, #tpu.memory_space<vmem>>, vector<1x16xf32>
      %31 = vector.broadcast %30 : vector<1x16xf32> to vector<8x16xf32>
      %32 = arith.addf %29, %31 : vector<8x16xf32>
      %c0_24 = arith.constant 0 : index
      %c0_25 = arith.constant 0 : index
      %33 = vector.load %arg8[%c0_24, %c0_25] : memref<32x32xbf16, #tpu.memory_space<vmem>>, vector<32x32xbf16>
      %cst_26 = arith.constant dense<0.000000e+00> : vector<8x32xf32>
      %34 = tpu.matmul %8, %33, %cst_26 {dimension_numbers = #tpu.dot_dimension_numbers<[1], [0], [0], [1], [0, 0, 1, 1], [], []>} : vector<8x32xbf16>, vector<32x32xbf16>, vector<8x32xf32> -> vector<8x32xf32>
      %c0_27 = arith.constant 0 : index
      %c0_28 = arith.constant 0 : index
      %35 = vector.load %arg9[%c0_27, %c0_28] : memref<1x32xf32, #tpu.memory_space<vmem>>, vector<1x32xf32>
      %36 = vector.broadcast %35 : vector<1x32xf32> to vector<8x32xf32>
      %37 = arith.addf %34, %36 : vector<8x32xf32>
      %38 = arith.mulf %37, %37 : vector<8x32xf32>
      %39 = arith.mulf %37, %38 : vector<8x32xf32>
      %cst_29 = arith.constant 4.471500e-02 : f32
      %40 = vector.broadcast %cst_29 : f32 to vector<8x32xf32>
      %41 = arith.mulf %40, %39 : vector<8x32xf32>
      %42 = arith.addf %37, %41 : vector<8x32xf32>
      %cst_30 = arith.constant 0.797884583 : f32
      %43 = vector.broadcast %cst_30 : f32 to vector<8x32xf32>
      %44 = arith.mulf %43, %42 : vector<8x32xf32>
      %45 = math.tanh %44 : vector<8x32xf32>
      %cst_31 = arith.constant 1.000000e+00 : f32
      %46 = vector.broadcast %cst_31 : f32 to vector<8x32xf32>
      %47 = arith.addf %46, %45 : vector<8x32xf32>
      %cst_32 = arith.constant 5.000000e-01 : f32
      %48 = vector.broadcast %cst_32 : f32 to vector<8x32xf32>
      %49 = arith.mulf %48, %47 : vector<8x32xf32>
      %50 = arith.mulf %37, %49 : vector<8x32xf32>
      %51 = arith.truncf %50 : vector<8x32xf32> to vector<8x32xbf16>
      %c0_33 = arith.constant 0 : index
      %c0_34 = arith.constant 0 : index
      %52 = vector.load %arg10[%c0_33, %c0_34] : memref<32x16xbf16, #tpu.memory_space<vmem>>, vector<32x16xbf16>
      %cst_35 = arith.constant dense<0.000000e+00> : vector<8x16xf32>
      %53 = tpu.matmul %51, %52, %cst_35 {dimension_numbers = #tpu.dot_dimension_numbers<[1], [0], [0], [1], [0, 0, 1, 1], [], []>} : vector<8x32xbf16>, vector<32x16xbf16>, vector<8x16xf32> -> vector<8x16xf32>
      %c0_36 = arith.constant 0 : index
      %c0_37 = arith.constant 0 : index
      %54 = vector.load %arg11[%c0_36, %c0_37] : memref<1x16xf32, #tpu.memory_space<vmem>>, vector<1x16xf32>
      %55 = vector.broadcast %54 : vector<1x16xf32> to vector<8x16xf32>
      %56 = arith.addf %53, %55 : vector<8x16xf32>
      %57 = arith.mulf %32, %32 : vector<8x16xf32>
      %cst_38 = arith.constant dense<0.000000e+00> : vector<8xf32>
      %58 = vector.multi_reduction <add>, %57, %cst_38 [1] : vector<8x16xf32> to vector<8xf32>
      %59 = vector.shape_cast %58 : vector<8xf32> to vector<8x1xf32>
      %cst_39 = arith.constant 1.000000e-16 : f32
      %60 = vector.broadcast %cst_39 : f32 to vector<8x1xf32>
      %61 = arith.maximumf %59, %60 : vector<8x1xf32>
      %62 = math.rsqrt %61 : vector<8x1xf32>
      %63 = arith.mulf %56, %56 : vector<8x16xf32>
      %cst_40 = arith.constant dense<0.000000e+00> : vector<8xf32>
      %64 = vector.multi_reduction <add>, %63, %cst_40 [1] : vector<8x16xf32> to vector<8xf32>
      %65 = vector.shape_cast %64 : vector<8xf32> to vector<8x1xf32>
      %cst_41 = arith.constant 1.000000e-16 : f32
      %66 = vector.broadcast %cst_41 : f32 to vector<8x1xf32>
      %67 = arith.maximumf %65, %66 : vector<8x1xf32>
      %68 = math.rsqrt %67 : vector<8x1xf32>
      %69 = vector.broadcast %62 : vector<8x1xf32> to vector<8x16xf32>
      %70 = arith.mulf %32, %69 : vector<8x16xf32>
      %71 = vector.broadcast %68 : vector<8x1xf32> to vector<8x16xf32>
      %72 = arith.mulf %56, %71 : vector<8x16xf32>
      %73 = arith.mulf %70, %72 : vector<8x16xf32>
      %cst_42 = arith.constant dense<0.000000e+00> : vector<8xf32>
      %74 = vector.multi_reduction <add>, %73, %cst_42 [1] : vector<8x16xf32> to vector<8xf32>
      %75 = vector.shape_cast %74 : vector<8xf32> to vector<8x1xf32>
      %cst_43 = arith.constant 14.2857141 : f32
      %76 = vector.broadcast %cst_43 : f32 to vector<8x1xf32>
      %77 = arith.mulf %75, %76 : vector<8x1xf32>
      %78 = vector.shape_cast %77 : vector<8x1xf32> to vector<8x1xf32>
      %79 = vector.broadcast %78 : vector<8x1xf32> to vector<8x128xf32>
      %c0_44 = arith.constant 0 : index
      %c0_45 = arith.constant 0 : index
      %80 = vector.load %arg13[%c0_44, %c0_45] : memref<8x128xf32, #tpu.memory_space<vmem>>, vector<8x128xf32>
      tpu.vector_store %arg13[%c0_44, %c0_45], %79 {strides = array<i32>} : memref<8x128xf32, #tpu.memory_space<vmem>>, vector<8x128xf32>,
      %cst_46 = arith.constant 14.2857141 : f32
      %81 = vector.broadcast %cst_46 : f32 to vector<8x16xf32>
      %82 = arith.mulf %70, %81 : vector<8x16xf32>
      %83 = arith.truncf %82 : vector<8x16xf32> to vector<8x16xbf16>
      %c0_47 = arith.constant 0 : index
      %c0_48 = arith.constant 0 : index
      %84 = vector.load %arg15[%c0_47, %c0_48] : memref<8x16xbf16, #tpu.memory_space<vmem>>, vector<8x16xbf16>
      tpu.vector_store %arg15[%c0_47, %c0_48], %83 {strides = array<i32>} : memref<8x16xbf16, #tpu.memory_space<vmem>>, vector<8x16xbf16>,
    } else {
    }
    %c0 = arith.constant 0 : index
    %c0_1 = arith.constant 0 : index
    %3 = vector.load %arg15[%c0, %c0_1] : memref<8x16xbf16, #tpu.memory_space<vmem>>, vector<8x16xbf16>
    %c0_2 = arith.constant 0 : index
    %c0_3 = arith.constant 0 : index
    %4 = vector.load %arg12[%c0_2, %c0_3] : memref<16x128xbf16, #tpu.memory_space<vmem>>, vector<16x128xbf16>
    %cst = arith.constant dense<0.000000e+00> : vector<8x128xf32>
    %5 = tpu.matmul %3, %4, %cst {dimension_numbers = #tpu.dot_dimension_numbers<[1], [0], [0], [1], [0, 0, 1, 1], [], []>} : vector<8x16xbf16>, vector<16x128xbf16>, vector<8x128xf32> -> vector<8x128xf32>
    %c0_4 = arith.constant 0 : index
    %c0_5 = arith.constant 0 : index
    %6 = vector.load %arg14[%c0_4, %c0_5] : memref<8x128xf32, #tpu.memory_space<vmem>>, vector<8x128xf32>
    tpu.vector_store %arg14[%c0_4, %c0_5], %5 {strides = array<i32>} : memref<8x128xf32, #tpu.memory_space<vmem>>, vector<8x128xf32>,
    return
  }
  func.func @transform_0(%arg0: i32, %arg1: i32) -> (i32, i32) {
    %c0_i32 = arith.constant 0 : i32
    %c0_i32_0 = arith.constant 0 : i32
    return %arg0, %c0_i32 : i32, i32
  }
  func.func @transform_1(%arg0: i32, %arg1: i32) -> (i32, i32) {
    %c0_i32 = arith.constant 0 : i32
    %c0_i32_0 = arith.constant 0 : i32
    return %arg0, %c0_i32 : i32, i32
  }
  func.func @transform_2(%arg0: i32, %arg1: i32) -> (i32, i32) {
    %c0_i32 = arith.constant 0 : i32
    %c0_i32_0 = arith.constant 0 : i32
    %c0_i32_1 = arith.constant 0 : i32
    return %c0_i32, %c0_i32_0 : i32, i32
  }
  func.func @transform_3(%arg0: i32, %arg1: i32) -> (i32, i32) {
    %c0_i32 = arith.constant 0 : i32
    %c0_i32_0 = arith.constant 0 : i32
    %c0_i32_1 = arith.constant 0 : i32
    return %c0_i32, %c0_i32_0 : i32, i32
  }
  func.func @transform_4(%arg0: i32, %arg1: i32) -> (i32, i32) {
    %c0_i32 = arith.constant 0 : i32
    %c0_i32_0 = arith.constant 0 : i32
    %c0_i32_1 = arith.constant 0 : i32
    return %c0_i32, %c0_i32_0 : i32, i32
  }
  func.func @transform_5(%arg0: i32, %arg1: i32) -> (i32, i32) {
    %c0_i32 = arith.constant 0 : i32
    %c0_i32_0 = arith.constant 0 : i32
    %c0_i32_1 = arith.constant 0 : i32
    return %c0_i32, %c0_i32_0 : i32, i32
  }
  func.func @transform_6(%arg0: i32, %arg1: i32) -> (i32, i32) {
    %c0_i32 = arith.constant 0 : i32
    %c0_i32_0 = arith.constant 0 : i32
    %c0_i32_1 = arith.constant 0 : i32
    return %c0_i32, %c0_i32_0 : i32, i32
  }
  func.func @transform_7(%arg0: i32, %arg1: i32) -> (i32, i32) {
    %c0_i32 = arith.constant 0 : i32
    %c0_i32_0 = arith.constant 0 : i32
    %c0_i32_1 = arith.constant 0 : i32
    return %c0_i32, %c0_i32_0 : i32, i32
  }
  func.func @transform_8(%arg0: i32, %arg1: i32) -> (i32, i32) {
    %c0_i32 = arith.constant 0 : i32
    %c0_i32_0 = arith.constant 0 : i32
    %c0_i32_1 = arith.constant 0 : i32
    return %c0_i32, %c0_i32_0 : i32, i32
  }
  func.func @transform_9(%arg0: i32, %arg1: i32) -> (i32, i32) {
    %c0_i32 = arith.constant 0 : i32
    %c0_i32_0 = arith.constant 0 : i32
    %c0_i32_1 = arith.constant 0 : i32
    return %c0_i32, %c0_i32_0 : i32, i32
  }
  func.func @transform_10(%arg0: i32, %arg1: i32) -> (i32, i32) {
    %c0_i32 = arith.constant 0 : i32
    %c0_i32_0 = arith.constant 0 : i32
    return %c0_i32, %arg1 : i32, i32
  }
  func.func @transform_11(%arg0: i32, %arg1: i32) -> (i32, i32) {
    %c0_i32 = arith.constant 0 : i32
    %c0_i32_0 = arith.constant 0 : i32
    return %arg0, %c0_i32 : i32, i32
  }
  func.func @transform_12(%arg0: i32, %arg1: i32) -> (i32, i32) {
    %c0_i32 = arith.constant 0 : i32
    return %arg0, %arg1 : i32, i32
  }
}

</mosaic_0001>

<bundles_post_ra>
// kernel: tpu_custom_call.1
= control target key start
LH: loop header
LB: loop body
LE: loop exit
PB: predicated region body
PF: predicated region fallthrough
CT: control target
= control target key end

     0   :  { %18 = vsyncpa [#allocation4], 0  ;;  %s841_s0 = inlined_call_operand.hbm [shape: bf16[8,32], index: 0, kind: input, shape index: {}]   ;;  %s842_s1 = inlined_call_operand.hbm [shape: bf16[8,32], index: 1, kind: input, shape index: {}]   ;;  %s843_s2 = inlined_call_operand.vmem [shape: bf16[32,32], index: 2, kind: input, shape index: {}]   ;;  %s844_s3 = inlined_call_operand.vmem [shape: f32[1,32], index: 3, kind: input, shape index: {}]   ;;  %s845_s4 = inlined_call_operand.vmem [shape: bf16[32,16], index: 4, kind: input, shape index: {}]   ;;  %s846_s5 = inlined_call_operand.vmem [shape: f32[1,16], index: 5, kind: input, shape index: {}]   ;;  %s847_s6 = inlined_call_operand.vmem [shape: bf16[32,32], index: 6, kind: input, shape index: {}]   ;;  %s848_s7 = inlined_call_operand.vmem [shape: f32[1,32], index: 7, kind: input, shape index: {}]   ;;  %s849_s8 = inlined_call_operand.vmem [shape: bf16[32,16], index: 8, kind: input, shape index: {}]   ;;  %s850_s9 = inlined_call_operand.vmem [shape: f32[1,16], index: 9, kind: input, shape index: {}]   ;;  %s851_s10 = inlined_call_operand.vmem [shape: bf16[16,128], index: 10, kind: input, shape index: {}]   ;;  %s852_s11 = inlined_call_operand.hbm [shape: f32[8,128], index: 11, kind: output, shape index: {0}]   ;;  %s853_s12 = inlined_call_operand.hbm [shape: f32[8,128], index: 12, kind: output, shape index: {1}]  }
   0x1   :  { %19 = vsyncpa [#allocation7], 0 }
   0x2   :  { %20 = vsyncpa [#allocation5], 0 }
   0x3   :  { %21 = vsyncpa [#allocation10], 0  ;;  %s656_s21 = smov [#allocation3]   ;;  %s657_s23 = smov [#allocation6]  }
   0x4   :  { %s28_s22 = sshll.u32 %s656_s21, 4  ;;  %s38_s24 = sshll.u32 %s657_s23, 4  ;;  %s29_s22 = int_to_ptr.vmem [resolvable:$true] %s28_s22  ;;  %s39_s24 = int_to_ptr.vmem [resolvable:$true] %s38_s24 }
   0x5   :  { %s560_s27 = scalar_lea.hbm %s841_s0, 64 }
   0x6   :  { %p561_p0 = scmp.ne.s32.totalorder %s841_s0, %s560_s27  ;;  %p564_p1 = scmp.lt.u32.totalorder %s560_s27, %s841_s0 }
   0x8   :  { %p566_p2 = pnand %p564_p1, %p561_p0 }
   0xa   :  { %569 = shalt.err (!%p566_p2)
}
   0xb   :  { %s570_s14 = scalar_lea.vmem %s29_s22, 64  ;;  %p575_p4 = scmp.lt.s32.totalorder %s29_s22, %s29_s22 }
   0xc   :  { %p571_p3 = scmp.ne.s32.totalorder %s29_s22, %s570_s14  ;;  %p576_p5 = scmp.lt.s32.totalorder %s570_s14, %s570_s14 }
   0xe   :  { %p577_p6 = por %p576_p5, %p575_p4 }
  0x10   :  { %p578_p7 = pnand %p577_p6, %p571_p3 }
  0x12   :  { %581 = shalt.err (!%p578_p7)
}
  0x13   :  { %31 = dma.hbm_to_vmem [thread:$0]  %s841_s0, 64, %s29_s22, [#allocation4]  }
  0x14   :  { %s582_s19 = scalar_lea.hbm %s842_s1, 64 }
  0x15   :  { %p583_p8 = scmp.ne.s32.totalorder %s842_s1, %s582_s19  ;;  %p586_p9 = scmp.lt.u32.totalorder %s582_s19, %s842_s1 }
  0x17   :  { %p588_p10 = pnand %p586_p9, %p583_p8 }
  0x19   :  { %591 = shalt.err (!%p588_p10)
}
  0x1a   :  { %s592_s26 = scalar_lea.vmem %s39_s24, 64  ;;  %p597_p12 = scmp.lt.s32.totalorder %s39_s24, %s39_s24 }
  0x1b   :  { %p593_p11 = scmp.ne.s32.totalorder %s39_s24, %s592_s26  ;;  %p598_p13 = scmp.lt.s32.totalorder %s592_s26, %s592_s26 }
  0x1d   :  { %p599_p0 = por %p598_p13, %p597_p12 }
  0x1f   :  { %p600_p1 = pnand %p599_p0, %p593_p11 }
  0x21   :  { %603 = shalt.err (!%p600_p1)
}
  0x22   :  { %41 = dma.hbm_to_vmem [thread:$0]  %s842_s1, 64, %s39_s24, [#allocation7]  }
  0x23   :  { %648 = dma.done.wait [#allocation4], 64  }
  0x24   :  { %649 = vsyncadd [#allocation4], 4294967232 }
  0x25   :  { %650 = dma.done.wait [#allocation7], 64  }
  0x26   :  { %651 = vsyncadd [#allocation7], 4294967232  ;;  %v658_v0 = vmov 0.0   ;;  %vm659_vm0 = vmmov 0   ;;  %v543_v1 = vld [vmem:[%s843_s2] sm:$0xff]   ;;  %v544_v2 = vld [vmem:[%s843_s2 + $0x8] sm:$0xff]  }
  0x27   :  { %499 = vmatprep.subr.bf16.mxu0 %v658_v0  ;;  %503 = vmatprep.mubr.msk.bf16.mxu0 %vm659_vm0, %v658_v0  ;;  %v71_v3 = vld [vmem:[#allocation3] sm:$0xf]  ;;  %vm96_vm1 = vcmask 261120   ;;  %v546_v5 = vld [vmem:[%s847_s6 + $0x8] sm:$0xff]   ;;  %v467_v9 = vld [vmem:[%s844_s3] ss:$0 sm:$0xff] }
  0x28   :  { %507 = vmatprep.subr.bf16.mxu1 %v658_v0  ;;  %511 = vmatprep.mubr.msk.bf16.mxu1 %vm659_vm0, %v658_v0  ;;  %v545_v4 = vld [vmem:[%s847_s6] sm:$0xff]   ;;  %v72_v6 = vld [vmem:[#allocation6] sm:$0xf]  ;;  %vm359_vm2 = vcmask 130048   ;;  %vm381_vm3 = vcmask 125952  }
  0x29   :  { %500 = vmatpush3.bf16.msra.mxu0 %v543_v1  ;;  %v547_v7 = vld [vmem:[%s845_s4] sm:$0xff]   ;;  %v548_v8 = vld [vmem:[%s845_s4 + $0x8] sm:$0xff]  }
  0x2a   :  { %501 = vmatprep.subr.bf16.mxu0 %v658_v0  ;;  %508 = vmatpush3.bf16.msra.mxu1 %v547_v7  ;;  %v475_v17 = vld [vmem:[%s848_s7] ss:$0 sm:$0xff]  ;;  %v550_v39 = vld [vmem:[%s849_s8 + $0x8] sm:$0xff]  }
  0x2b   :  { %509 = vmatprep.subr.bf16.mxu1 %v658_v0  ;;  %v549_v35 = vld [vmem:[%s849_s8] sm:$0xff]  }
  0x2c   :  { %v471_v43 = vld [vmem:[%s846_s5] ss:$0 sm:$0xff] }
  0x2d   :  { %502 = vmatpush3.bf16.msra.mxu0 %v544_v2  ;;  %v479_v51 = vld [vmem:[%s850_s9] ss:$0 sm:$0xff]  ;;  %s660_s9 = smov [#allocation8]  }
  0x2e   :  { %515 = vmatprep.subr.bf16.mxu0 %v658_v0  ;;  %510 = vmatpush3.bf16.msra.mxu1 %v548_v8  ;;  %v551_v59 = vld [vmem:[%s851_s10] sm:$0xff]   ;;  %s443_s10 = sshll.u32 %s660_s9, 4  ;;  %s444_s10 = int_to_ptr.vmem [resolvable:$true] %s443_s10 }
  0x2f   :  { %523 = vmatprep.subr.bf16.mxu1 %v658_v0  ;;  %s604_s22 = scalar_lea.vmem %s444_s10, 128  ;;  %p609_p3 = scmp.lt.s32.totalorder %s444_s10, %s444_s10 }
  0x30   :  { %504 = vmatmul.mubr.msk.bf16.vlgmr.msra.gmra.mrb[0].mxu0 %vm96_vm1, %v71_v3  ;;  %p605_p2 = scmp.ne.s32.totalorder %s444_s10, %s604_s22  ;;  %p610_p4 = scmp.lt.s32.totalorder %s604_s22, %s604_s22 }
  0x31   :  { %516 = vmatpush3.bf16.msra.mxu0 %v545_v4  ;;  %519 = vmatprep.mubr.msk.bf16.mxu0 %vm659_vm0, %v658_v0 }
  0x32   :  { %517 = vmatprep.subr.bf16.mxu0 %v658_v0  ;;  %p611_p5 = por %p610_p4, %p609_p3 }
  0x34   :  { %p612_p6 = pnand %p611_p5, %p605_p2 }
  0x35   :  { %518 = vmatpush3.bf16.msra.mxu0 %v546_v5 }
  0x36   :  { %531 = vmatprep.subr.bf16.mxu0 %v658_v0 }
  0x38   :  { %520 = vmatmul.mubr.msk.bf16.vlgmr.msra.gmra.mrb[4].mxu0 %vm96_vm1, %v72_v6 }
  0x39   :  { %533 = vmatprep.mubr.msk.bf16.mxu0 %vm659_vm0, %v658_v0  ;;  %532 = vmatpush3.bf16.msra.mxu0 %v551_v59 }
 0x103   :  { %v134_v10 = vpop.f32.mrb[0].mxu0 }
 0x104   :  { %v135_v11 = vadd.f32 %v467_v9, %v134_v10  ;;  %v505_v12 = vpop.f32.mrb[1].mxu0 }
 0x105   :  { %v137_v13 = vpop.f32.mrb[2].mxu0 }
 0x106   :  { %v140_v14 = vmul.f32 %v135_v11, %v135_v11  ;;  %v506_v15 = vpop.f32.mrb[3].mxu0 }
 0x108   :  { %v141_v16 = vmul.f32 %v140_v14, %v135_v11 }
 0x10a   :  { %v142_v18 = vmul.f32 0.044715, %v141_v16 }
 0x10b   :  { %v276_v19 = vpop.f32.mrb[4].mxu0 }
 0x10c   :  { %v143_v20 = vadd.f32 %v142_v18, %v135_v11  ;;  %v277_v21 = vadd.f32 %v475_v17, %v276_v19  ;;  %v521_v22 = vpop.f32.mrb[5].mxu0 }
 0x10d   :  { %v279_v23 = vpop.f32.mrb[6].mxu0 }
 0x10e   :  { %v144_v24 = vmul.f32 0.7978846, %v143_v20  ;;  %v282_v25 = vmul.f32 %v277_v21, %v277_v21  ;;  %v522_v26 = vpop.f32.mrb[7].mxu0 }
 0x110   :  { %552 = vtanh.f32 %v144_v24  ;;  %v283_v27 = vmul.f32 %v282_v25, %v277_v21 }
 0x112   :  { %v284_v28 = vmul.f32 0.044715, %v283_v27 }
 0x114   :  { %v285_v29 = vadd.f32 %v284_v28, %v277_v21 }
 0x116   :  { %v286_v30 = vmul.f32 0.7978846, %v285_v29 }
 0x118   :  { %554 = vtanh.f32 %v286_v30 }
 0x11a   :  { %v553_v31 = vpop.eup %552 }
 0x11b   :  { %v146_v32 = vadd.f32 1.0, %v553_v31 }
 0x11d   :  { %v147_v33 = vmul.f32 0.5, %v146_v32 }
 0x11f   :  { %v148_v34 = vmul.f32 %v147_v33, %v135_v11 }
 0x121   :  { %v149_v36 = vpack.c.bf16 %v148_v34, %v148_v34 }
 0x122   :  { %v555_v37 = vpop.eup %554 }
 0x123   :  { %v288_v38 = vadd.f32 1.0, %v555_v37  ;;  %512 = vmatmul.mubr.msk.bf16.vlgmr.msra.gmra.mrb[0].mxu1 %vm96_vm1, %v149_v36 }
 0x124   :  { %524 = vmatpush3.bf16.msra.mxu1 %v549_v35  ;;  %527 = vmatprep.mubr.msk.bf16.mxu1 %vm659_vm0, %v658_v0 }
 0x125   :  { %v289_v40 = vmul.f32 0.5, %v288_v38  ;;  %525 = vmatprep.subr.bf16.mxu1 %v658_v0 }
 0x127   :  { %v290_v41 = vmul.f32 %v289_v40, %v277_v21 }
 0x128   :  { %526 = vmatpush3.bf16.msra.mxu1 %v550_v39 }
 0x129   :  { %v291_v42 = vpack.c.bf16 %v290_v41, %v290_v41 }
 0x12b   :  { %528 = vmatmul.mubr.msk.bf16.vlgmr.msra.gmra.mrb[4].mxu1 %vm96_vm1, %v291_v42 }
 0x1f6   :  { %v210_v44 = vpop.f32.mrb[0].mxu1 }
 0x1f7   :  { %v211_v45 = vadd.f32 %v471_v43, %v210_v44  ;;  %v513_v46 = vpop.f32.mrb[1].mxu1 }
 0x1f8   :  { %v213_v47 = vpop.f32.mrb[2].mxu1 }
 0x1f9   :  { %v514_v48 = vpop.f32.mrb[3].mxu1  ;;  %v358_v49 = vmul.f32 %v211_v45, %v211_v45 }
 0x1fb   :  { %v360_v50 = vsel %vm359_vm2, %v358_v49, 0.0 }
 0x1fc   :  { %361 = vadd.xlane.f32.xlu0 %v360_v50 }
 0x1fe   :  { %v352_v52 = vpop.f32.mrb[4].mxu1 }
 0x1ff   :  { %v353_v53 = vadd.f32 %v479_v51, %v352_v52  ;;  %v529_v54 = vpop.f32.mrb[5].mxu1 }
 0x200   :  { %v355_v55 = vpop.f32.mrb[6].mxu1 }
 0x201   :  { %v365_v56 = vmul.f32 %v353_v53, %v353_v53  ;;  %v530_v57 = vpop.f32.mrb[7].mxu1 }
 0x203   :  { %v366_v58 = vsel %vm359_vm2, %v365_v56, 0.0 }
 0x204   :  { %367 = vadd.xlane.f32.xlu0 %v366_v58 }
 0x289   :  { %v362_v60 = vpop.xlane.xlu0 %361 }
 0x28a   :  { %v363_v61 = vmax.f32 %v362_v60, 1e-16 }
 0x28c   :  { %556 = vrsqrt.f32 %v363_v61 }
 0x291   :  { %v368_v62 = vpop.xlane.xlu0 %367 }
 0x292   :  { %v369_v63 = vmax.f32 %v368_v62, 1e-16 }
 0x294   :  { %558 = vrsqrt.f32 %v369_v63 }
 0x296   :  { %v557_v0 = vpop.eup %556 }
 0x297   :  { %v371_v1 = vmul.f32 %v557_v0, %v211_v45 }
 0x299   :  { %v379_v2 = vmul.f32 14.285714, %v371_v1 }
 0x29b   :  { %v380_v3 = vpack.c.bf16 %v379_v2, %v379_v2 }
 0x29d   :  { %382 = vst.msk [vmem:[#allocation2] sm:$0xf] %vm381_vm3, %v380_v3 }
 0x29e   :  { %v559_v4 = vpop.eup %558 }
 0x29f   :  { %v372_v5 = vmul.f32 %v559_v4, %v353_v53 }
 0x2a1   :  { %v373_v6 = vmul.f32 %v372_v5, %v371_v1 }
 0x2a3   :  { %v374_v7 = vsel %vm359_vm2, %v373_v6, 0.0 }
 0x2a4   :  { %375 = vadd.xlane.f32.xlu1 %v374_v7  ;;  %v383_v8 = vld [vmem:[#allocation2] sm:$0xf] }
 0x2a5   :  { %534 = vmatmul.mubr.msk.bf16.vlgmr.msra.gmra.mrb[8].mxu0 %vm359_vm2, %v383_v8 }
 0x331   :  { %v376_v9 = vpop.xlane.xlu1 %375 }
 0x332   :  { %v377_v10 = vmul.f32 14.285714, %v376_v9 }
 0x334   :  { %378 = vst [vmem:[#allocation8] sm:$0xff] %v377_v10 }
 0x335   :  { %615 = shalt.err (!%p612_p6)
}
 0x336   :  { %s616_s1 = scalar_lea.hbm %s852_s11, 128 }
 0x337   :  { %p617_p7 = scmp.ne.s32.totalorder %s852_s11, %s616_s1  ;;  %p620_p8 = scmp.lt.u32.totalorder %s616_s1, %s852_s11 }
 0x339   :  { %p622_p9 = pnand %p620_p8, %p617_p7 }
 0x33b   :  { %625 = shalt.err (!%p622_p9)
}
 0x33c   :  { %446 = dma.vmem_to_hbm [thread:$0]  %s444_s10, 128, %s852_s11, [#allocation5]  }
 0x33d   :  { %s661_s15 = smov [#allocation9]  }
 0x33e   :  { %s453_s6 = sshll.u32 %s661_s15, 4  ;;  %s454_s6 = int_to_ptr.vmem [resolvable:$true] %s453_s6 }
 0x33f   :  { %s626_s16 = scalar_lea.vmem %s454_s6, 128  ;;  %p631_p11 = scmp.lt.s32.totalorder %s454_s6, %s454_s6 }
 0x340   :  { %p627_p10 = scmp.ne.s32.totalorder %s454_s6, %s626_s16  ;;  %p632_p12 = scmp.lt.s32.totalorder %s626_s16, %s626_s16 }
 0x342   :  { %p633_p13 = por %p632_p12, %p631_p11 }
 0x344   :  { %p634_p0 = pnand %p633_p13, %p627_p10 }
 0x378   :  { %v430_v11 = vpop.f32.mrb[8].mxu0 }
 0x379   :  { %436 = vst [vmem:[#allocation9] sm:$0xff] %v430_v11  ;;  %v535_v12 = vpop.f32.mrb[9].mxu0 }
 0x37a   :  { %v433_v13 = vpop.f32.mrb[10].mxu0 }
 0x37b   :  { %637 = shalt.err (!%p634_p0)
}
 0x37c   :  { %s638_s19 = scalar_lea.hbm %s853_s12, 128 }
 0x37d   :  { %p639_p1 = scmp.ne.s32.totalorder %s853_s12, %s638_s19  ;;  %p642_p2 = scmp.lt.u32.totalorder %s638_s19, %s853_s12 }
 0x37f   :  { %p644_p3 = pnand %p642_p2, %p639_p1 }
 0x381   :  { %647 = shalt.err (!%p644_p3)
}
 0x382   :  { %456 = dma.vmem_to_hbm [thread:$0]  %s454_s6, 128, %s853_s12, [#allocation10]   ;;  %v536_v14 = vpop.f32.mrb[11].mxu0 }
 0x383   :  { %652 = dma.done.wait [#allocation5], 128  }
 0x384   :  { %653 = vsyncadd [#allocation5], 4294967168 }
 0x385   :  { %654 = dma.done.wait [#allocation10], 128  }
 0x386   :  { %655 = vsyncadd [#allocation10], 4294967168 }
 0x387   :  { %463 = vsyncpa [#allocation4], 1 }
 0x388   :  { %464 = vsyncpa [#allocation7], 1 }
 0x389   :  { %465 = vsyncpa [#allocation5], 1 }
 0x38a   :  { %466 = vsyncpa [#allocation10], 1 }

</bundles_post_ra>
